<compile_context>
chip_gen: v6e
topology: v6e:2x2x1
jax: 0.10.0
libtpu: 0.0.40
codegen_flags: <defaults>
</compile_context>

<pallas_src>
import jax
import jax.numpy as jnp
from jax.experimental import pallas as pl
from jax.experimental.pallas import tpu as pltpu

HIDDEN = 256


def _round_up(n, m):
    return ((n + m - 1) // m) * m


def _cdiv(a, b):
    return -(-a // b)


def _dynamics_kernel(x_ref, w1_ref, b1_ref, w2_ref, b2_ref, o_ref):
    # In-VMEM cast of the x tile to the MXU compute dtype (free: VPU has slack).
    x = x_ref[...].astype(w1_ref.dtype)
    # fc1 on the MXU with f32 accumulation; bias add + ReLU in f32.
    h = jnp.dot(x, w1_ref[...], preferred_element_type=jnp.float32)
    h = jnp.maximum(h + b1_ref[...], 0.0)
    # fc2: feed the MXU in the compute dtype again, accumulate in f32.
    h = h.astype(w2_ref.dtype)
    y = jnp.dot(h, w2_ref[...], preferred_element_type=jnp.float32)
    y = jnp.maximum(y + b2_ref[...], 0.0)
    o_ref[...] = y.astype(o_ref.dtype)


def dynamics_model_forward(x, w1, b1, w2, b2, *, block_rows=1024,
                           compute_dtype=jnp.bfloat16, out_dtype=None):
    """Fused forward of DynamicsModel.

    x: (B, 256); w1, w2: (256, 256) stored as (in, out) so y = x @ W + b;
    b1, b2: (256,).

    compute_dtype controls the MXU input dtype (default bf16 = native MXU rate;
    use jnp.float32 for exact PyTorch parity at a 2-4x cost on v5e/v7x).
    Accumulation, bias add and ReLU are always f32.  out_dtype defaults to
    x.dtype.
    """
    B, D = x.shape
    assert D == HIDDEN
    if out_dtype is None:
        out_dtype = x.dtype
    compute_dtype = jnp.dtype(compute_dtype)

    # ---- batch tile ---------------------------------------------------------
    # tb is a multiple of 8 sublanes and never exceeds B; ragged tails are
    # handled by the cdiv grid (Pallas masks OOB rows of the partial last tile).
    if B < 8:
        tb = B                                   # block == full array dim (allowed)
    else:
        tb = max(8, (min(int(block_rows), B) // 8) * 8)
        if B >= 16:
            # Guarantee >= 2 grid tiles so the "parallel" axis maps onto both
            # v7x TensorCores (no-op on v5e/v6e).
            tb = min(tb, _round_up(_cdiv(B, 2), 8))
    n_tiles = _cdiv(B, tb)

    # Weights/biases are tiny (<= 256 KiB each); casting them wrapper-side is fine.
    w1_c = w1.astype(compute_dtype)
    w2_c = w2.astype(compute_dtype)
    b1_2d = b1.reshape(1, HIDDEN).astype(jnp.float32)
    b2_2d = b2.reshape(1, HIDDEN).astype(jnp.float32)

    flops = 2 * 2 * B * HIDDEN * HIDDEN
    bytes_accessed = (
        B * HIDDEN * jnp.dtype(x.dtype).itemsize                # x (read in caller dtype)
        + 2 * HIDDEN * HIDDEN * compute_dtype.itemsize          # w1, w2
        + 2 * HIDDEN * 4                                        # b1, b2 (f32)
        + B * HIDDEN * jnp.dtype(out_dtype).itemsize            # out
    )

    return pl.pallas_call(
        _dynamics_kernel,
        out_shape=jax.ShapeDtypeStruct((B, HIDDEN), out_dtype),
        grid_spec=pltpu.PrefetchScalarGridSpec(
            num_scalar_prefetch=0,
            grid=(n_tiles,),
            in_specs=[
                pl.BlockSpec((tb, HIDDEN), lambda i: (i, 0)),        # x tile (pipelined)
                pl.BlockSpec((HIDDEN, HIDDEN), lambda i: (0, 0)),    # w1 (VMEM-resident)
                pl.BlockSpec((1, HIDDEN), lambda i: (0, 0)),         # b1 (VMEM-resident)
                pl.BlockSpec((HIDDEN, HIDDEN), lambda i: (0, 0)),    # w2 (VMEM-resident)
                pl.BlockSpec((1, HIDDEN), lambda i: (0, 0)),         # b2 (VMEM-resident)
            ],
            out_specs=pl.BlockSpec((tb, HIDDEN), lambda i: (i, 0)),
        ),
        compiler_params=pltpu.CompilerParams(
            dimension_semantics=("parallel",),
            vmem_limit_bytes=32 * 1024 * 1024,
        ),
        cost_estimate=pl.CostEstimate(
            flops=flops, transcendentals=0, bytes_accessed=bytes_accessed),
    )(x, w1_c, b1_2d, w2_c, b2_2d)


def init_params(key):
    """Deterministic init mirroring nn.Linear's uniform(-1/sqrt(in), 1/sqrt(in))."""
    k1, k2, k3, k4 = jax.random.split(key, 4)
    bound = 1.0 / jnp.sqrt(jnp.float32(HIDDEN))
    w1 = jax.random.uniform(k1, (HIDDEN, HIDDEN), jnp.float32, -bound, bound)
    b1 = jax.random.uniform(k2, (HIDDEN,), jnp.float32, -bound, bound)
    w2 = jax.random.uniform(k3, (HIDDEN, HIDDEN), jnp.float32, -bound, bound)
    b2 = jax.random.uniform(k4, (HIDDEN,), jnp.float32, -bound, bound)
    return w1, b1, w2, b2


def _reference(x, w1, b1, w2, b2):
    h = jnp.maximum(x @ w1 + b1, 0.0)
    return jnp.maximum(h @ w2 + b2, 0.0)


if __name__ == "__main__":
    key = jax.random.PRNGKey(0)
    kx, kp = jax.random.split(key)
    w1, b1, w2, b2 = init_params(kp)

    # --- Small batch, default path (bf16 MXU inputs, f32 accum, f32 output) --
    B = 8
    x = jax.random.normal(kx, (B, HIDDEN), jnp.float32)
    ref = _reference(x, w1, b1, w2, b2)
    out_bf16 = jax.block_until_ready(dynamics_model_forward(x, w1, b1, w2, b2))
    assert out_bf16.shape == (B, HIDDEN)
    assert jnp.allclose(out_bf16, ref, atol=5e-2, rtol=5e-2)

    # --- Exact f32 path (PyTorch parity) -------------------------------------
    out_f32 = jax.block_until_ready(
        dynamics_model_forward(x, w1, b1, w2, b2, compute_dtype=jnp.float32))
    assert jnp.allclose(out_f32, ref, atol=1e-5, rtol=1e-5)

    # --- Sub-8 batch: block equals the full (small) batch dim ----------------
    B3 = 4
    x3 = jax.random.normal(jax.random.PRNGKey(2), (B3, HIDDEN), jnp.float32)
    out3 = jax.block_until_ready(
        dynamics_model_forward(x3, w1, b1, w2, b2, compute_dtype=jnp.float32))
    assert out3.shape == (B3, HIDDEN)
    assert jnp.allclose(out3, _reference(x3, w1, b1, w2, b2), atol=1e-5, rtol=1e-5)

    # --- Multi-tile + ragged batch: cdiv grid, masked partial last tile, -----
    # --- and the >=2-tile split that keeps both v7x TensorCores busy ---------
    B2 = 200
    x2 = jax.random.normal(jax.random.PRNGKey(1), (B2, HIDDEN), jnp.float32)
    out2 = jax.block_until_ready(
        dynamics_model_forward(x2, w1, b1, w2, b2, block_rows=64,
                               compute_dtype=jnp.float32))
    assert out2.shape == (B2, HIDDEN)
    assert jnp.allclose(out2, _reference(x2, w1, b1, w2, b2), atol=1e-5, rtol=1e-5)

    print("KERNEL_OK")
</pallas_src>

<mosaic_0001>
module attributes {stable_mosaic.version = 11 : i64} {
  func.func @_dynamics_kernel(%arg0: i32, %arg1: memref<8x256xf32, #tpu.memory_space<vmem>>, %arg2: memref<256x256xbf16, #tpu.memory_space<vmem>>, %arg3: memref<1x256xf32, #tpu.memory_space<vmem>>, %arg4: memref<256x256xbf16, #tpu.memory_space<vmem>>, %arg5: memref<1x256xf32, #tpu.memory_space<vmem>>, %arg6: memref<8x256xf32, #tpu.memory_space<vmem>>) attributes {dimension_semantics = [#tpu.dimension_semantics<parallel>], iteration_bounds = array<i64: 1>, scalar_prefetch = 0 : i64, scratch_operands = 0 : i64, tpu.core_type = #tpu.core_type<tc>, window_params = [{transform_indices = @transform_0, window_bounds = array<i64: 8, 256>}, {pipeline_mode = #tpu.pipeline_mode<synchronous>, transform_indices = @transform_1, window_bounds = array<i64: 256, 256>}, {pipeline_mode = #tpu.pipeline_mode<synchronous>, transform_indices = @transform_2, window_bounds = array<i64: 1, 256>}, {pipeline_mode = #tpu.pipeline_mode<synchronous>, transform_indices = @transform_3, window_bounds = array<i64: 256, 256>}, {pipeline_mode = #tpu.pipeline_mode<synchronous>, transform_indices = @transform_4, window_bounds = array<i64: 1, 256>}, {transform_indices = @transform_5, window_bounds = array<i64: 8, 256>}]} {
    %c0 = arith.constant 0 : index
    %c0_0 = arith.constant 0 : index
    %0 = vector.load %arg1[%c0, %c0_0] : memref<8x256xf32, #tpu.memory_space<vmem>>, vector<8x256xf32>
    %1 = arith.truncf %0 : vector<8x256xf32> to vector<8x256xbf16>
    %c0_1 = arith.constant 0 : index
    %c0_2 = arith.constant 0 : index
    %2 = vector.load %arg2[%c0_1, %c0_2] : memref<256x256xbf16, #tpu.memory_space<vmem>>, vector<256x256xbf16>
    %cst = arith.constant dense<0.000000e+00> : vector<8x256xf32>
    %3 = tpu.matmul %1, %2, %cst {dimension_numbers = #tpu.dot_dimension_numbers<[1], [0], [0], [1], [0, 0, 1, 1], [], []>} : vector<8x256xbf16>, vector<256x256xbf16>, vector<8x256xf32> -> vector<8x256xf32>
    %c0_3 = arith.constant 0 : index
    %c0_4 = arith.constant 0 : index
    %4 = vector.load %arg3[%c0_3, %c0_4] : memref<1x256xf32, #tpu.memory_space<vmem>>, vector<1x256xf32>
    %5 = vector.broadcast %4 : vector<1x256xf32> to vector<8x256xf32>
    %6 = arith.addf %3, %5 : vector<8x256xf32>
    %cst_5 = arith.constant 0.000000e+00 : f32
    %7 = vector.broadcast %cst_5 : f32 to vector<8x256xf32>
    %8 = arith.maximumf %6, %7 : vector<8x256xf32>
    %9 = arith.truncf %8 : vector<8x256xf32> to vector<8x256xbf16>
    %c0_6 = arith.constant 0 : index
    %c0_7 = arith.constant 0 : index
    %10 = vector.load %arg4[%c0_6, %c0_7] : memref<256x256xbf16, #tpu.memory_space<vmem>>, vector<256x256xbf16>
    %cst_8 = arith.constant dense<0.000000e+00> : vector<8x256xf32>
    %11 = tpu.matmul %9, %10, %cst_8 {dimension_numbers = #tpu.dot_dimension_numbers<[1], [0], [0], [1], [0, 0, 1, 1], [], []>} : vector<8x256xbf16>, vector<256x256xbf16>, vector<8x256xf32> -> vector<8x256xf32>
    %c0_9 = arith.constant 0 : index
    %c0_10 = arith.constant 0 : index
    %12 = vector.load %arg5[%c0_9, %c0_10] : memref<1x256xf32, #tpu.memory_space<vmem>>, vector<1x256xf32>
    %13 = vector.broadcast %12 : vector<1x256xf32> to vector<8x256xf32>
    %14 = arith.addf %11, %13 : vector<8x256xf32>
    %cst_11 = arith.constant 0.000000e+00 : f32
    %15 = vector.broadcast %cst_11 : f32 to vector<8x256xf32>
    %16 = arith.maximumf %14, %15 : vector<8x256xf32>
    %c0_12 = arith.constant 0 : index
    %c0_13 = arith.constant 0 : index
    %17 = vector.load %arg6[%c0_12, %c0_13] : memref<8x256xf32, #tpu.memory_space<vmem>>, vector<8x256xf32>
    tpu.vector_store %arg6[%c0_12, %c0_13], %16 {strides = array<i32>} : memref<8x256xf32, #tpu.memory_space<vmem>>, vector<8x256xf32>,
    return
  }
  func.func @transform_0(%arg0: i32) -> (i32, i32) {
    %c0_i32 = arith.constant 0 : i32
    %c0_i32_0 = arith.constant 0 : i32
    return %arg0, %c0_i32 : i32, i32
  }
  func.func @transform_1(%arg0: i32) -> (i32, i32) {
    %c0_i32 = arith.constant 0 : i32
    %c0_i32_0 = arith.constant 0 : i32
    %c0_i32_1 = arith.constant 0 : i32
    return %c0_i32, %c0_i32_0 : i32, i32
  }
  func.func @transform_2(%arg0: i32) -> (i32, i32) {
    %c0_i32 = arith.constant 0 : i32
    %c0_i32_0 = arith.constant 0 : i32
    %c0_i32_1 = arith.constant 0 : i32
    return %c0_i32, %c0_i32_0 : i32, i32
  }
  func.func @transform_3(%arg0: i32) -> (i32, i32) {
    %c0_i32 = arith.constant 0 : i32
    %c0_i32_0 = arith.constant 0 : i32
    %c0_i32_1 = arith.constant 0 : i32
    return %c0_i32, %c0_i32_0 : i32, i32
  }
  func.func @transform_4(%arg0: i32) -> (i32, i32) {
    %c0_i32 = arith.constant 0 : i32
    %c0_i32_0 = arith.constant 0 : i32
    %c0_i32_1 = arith.constant 0 : i32
    return %c0_i32, %c0_i32_0 : i32, i32
  }
  func.func @transform_5(%arg0: i32) -> (i32, i32) {
    %c0_i32 = arith.constant 0 : i32
    %c0_i32_0 = arith.constant 0 : i32
    return %arg0, %c0_i32 : i32, i32
  }
}

</mosaic_0001>

<bundles_post_ra>
// kernel: tpu_custom_call.1
= control target key start
LH: loop header
LB: loop body
LE: loop exit
PB: predicated region body
PF: predicated region fallthrough
CT: control target
= control target key end

     0   :  { %10 = vsyncpa [#allocation3], 0  ;;  %s884_s0 = inlined_call_operand.hbm [shape: f32[8,256], index: 0, kind: input, shape index: {}]   ;;  %s885_s1 = inlined_call_operand.hbm [shape: bf16[256,256], index: 1, kind: input, shape index: {}]   ;;  %s886_s2 = inlined_call_operand.vmem [shape: f32[1,256], index: 2, kind: input, shape index: {}]   ;;  %s887_s3 = inlined_call_operand.hbm [shape: bf16[256,256], index: 3, kind: input, shape index: {}]   ;;  %s888_s4 = inlined_call_operand.vmem [shape: f32[1,256], index: 4, kind: input, shape index: {}]   ;;  %s889_s5 = inlined_call_operand.hbm [shape: f32[8,256], index: 5, kind: output, shape index: {}]  }
   0x1   :  { %11 = vsyncpa [#allocation6], 0 }
   0x2   :  { %12 = vsyncpa [#allocation4], 0  ;;  %s830_s18 = smov [#allocation5]  }
   0x3   :  { %s28_s19 = sshll.u32 %s830_s18, 4  ;;  %s29_s19 = int_to_ptr.vmem [resolvable:$true] %s28_s19 }
   0x4   :  { %s752_s20 = scalar_lea.vmem %s29_s19, 4096  ;;  %p757_p1 = scmp.lt.s32.totalorder %s29_s19, %s29_s19 }
   0x5   :  { %p753_p0 = scmp.ne.s32.totalorder %s29_s19, %s752_s20  ;;  %p758_p2 = scmp.lt.s32.totalorder %s752_s20, %s752_s20 }
   0x7   :  { %p759_p3 = por %p758_p2, %p757_p1 }
   0x9   :  { %p760_p4 = pnand %p759_p3, %p753_p0 }
   0xb   :  { %763 = shalt.err (!%p760_p4)
}
   0xc   :  { %s831_s21 = smov 128   ;;  %s832_s22 = smov 8  }
   0xd   :  { %34 = dma.hbm_to_vmem [thread:$0]  %s885_s1, 4096, %s29_s19, [#allocation6], %s831_s21, %s831_s21, %s832_s22  }
   0xe   :  { %s833_s25 = smov [#allocation2]   ;;  %s834_s27 = smov [#allocation7]  }
   0xf   :  { %s19_s26 = sshll.u32 %s833_s25, 4  ;;  %s42_s28 = sshll.u32 %s834_s27, 4  ;;  %s20_s26 = int_to_ptr.vmem [resolvable:$true] %s19_s26  ;;  %s43_s28 = int_to_ptr.vmem [resolvable:$true] %s42_s28 }
  0x10   :  { %s772_s29 = scalar_lea.vmem %s20_s26, 256  ;;  %p777_p6 = scmp.lt.s32.totalorder %s20_s26, %s20_s26 }
  0x11   :  { %p773_p5 = scmp.ne.s32.totalorder %s20_s26, %s772_s29  ;;  %p778_p7 = scmp.lt.s32.totalorder %s772_s29, %s772_s29 }
  0x13   :  { %p779_p8 = por %p778_p7, %p777_p6 }
  0x15   :  { %p780_p9 = pnand %p779_p8, %p773_p5 }
  0x17   :  { %783 = shalt.err (!%p780_p9)
}
  0x18   :  { %22 = dma.hbm_to_vmem [thread:$0]  %s884_s0, 256, %s20_s26, [#allocation3]  }
  0x19   :  { %s792_s7 = scalar_lea.vmem %s43_s28, 4096  ;;  %p797_p11 = scmp.lt.s32.totalorder %s43_s28, %s43_s28 }
  0x1a   :  { %p793_p10 = scmp.ne.s32.totalorder %s43_s28, %s792_s7  ;;  %p798_p12 = scmp.lt.s32.totalorder %s792_s7, %s792_s7 }
  0x1c   :  { %p799_p13 = por %p798_p12, %p797_p11 }
  0x1e   :  { %p800_p0 = pnand %p799_p13, %p793_p10 }
  0x20   :  { %803 = shalt.err (!%p800_p0)
}
  0x21   :  { %48 = dma.hbm_to_vmem [thread:$0]  %s887_s3, 4096, %s43_s28, [#allocation6], %s831_s21, %s831_s21, %s832_s22  }
  0x22   :  { %824 = dma.done.wait [#allocation3], 256  }
  0x23   :  { %825 = vsyncadd [#allocation3], 4294967040 }
  0x24   :  { %826 = dma.done.wait [#allocation6], 8192  }
  0x25   :  { %827 = vsyncadd [#allocation6], 4294959104  ;;  %v648_v0 = vld [vmem:[#allocation5 + $0x74] ss:$8 sps:$4 sm:$0xff]   ;;  %v650_v1 = vld [vmem:[#allocation5 + $0x70] ss:$8 sps:$4 sm:$0xff]  }
  0x26   :  { %268 = vmatprep.subr.bf16.mxu0 %v648_v0  ;;  %v651_v2 = vld [vmem:[#allocation5 + $0x64] ss:$8 sps:$4 sm:$0xff]   ;;  %v653_v3 = vld [vmem:[#allocation5 + $0x60] ss:$8 sps:$4 sm:$0xff]   ;;  %v654_v4 = vld [vmem:[#allocation5 + $0x54] ss:$8 sps:$4 sm:$0xff]  }
  0x27   :  { %269 = vmatpush1.bf16.msra.mxu0 %v650_v1  ;;  %v656_v5 = vld [vmem:[#allocation5 + $0x50] ss:$8 sps:$4 sm:$0xff]   ;;  %v657_v6 = vld [vmem:[#allocation5 + $0x44] ss:$8 sps:$4 sm:$0xff]   ;;  %v659_v7 = vld [vmem:[#allocation5 + $0x40] ss:$8 sps:$4 sm:$0xff]  }
  0x28   :  { %270 = vmatprep.subr.bf16.mxu0 %v651_v2  ;;  %v660_v8 = vld [vmem:[#allocation5 + $0x34] ss:$8 sps:$4 sm:$0xff]   ;;  %v662_v9 = vld [vmem:[#allocation5 + $0x30] ss:$8 sps:$4 sm:$0xff]   ;;  %v663_v10 = vld [vmem:[#allocation5 + $0x24] ss:$8 sps:$4 sm:$0xff]  }
  0x29   :  { %v665_v11 = vld [vmem:[#allocation5 + $0x20] ss:$8 sps:$4 sm:$0xff]   ;;  %v666_v12 = vld [vmem:[#allocation5 + $0x14] ss:$8 sps:$4 sm:$0xff]   ;;  %v668_v13 = vld [vmem:[#allocation5 + $0x10] ss:$8 sps:$4 sm:$0xff]  }
  0x2a   :  { %v61_v14 = vld [vmem:[#allocation2 + $0x8] sm:$0xff]  ;;  %v669_v18 = vld [vmem:[#allocation5 + $0x4] ss:$8 sps:$4 sm:$0xff]   ;;  %v671_v20 = vld [vmem:[#allocation5] ss:$8 sps:$4 sm:$0xff]  }
  0x2b   :  { %271 = vmatpush1.bf16.msra.mxu0 %v653_v3  ;;  %v63_v15 = vpack.c.bf16 %v61_v14, %v61_v14  ;;  %v696_v16 = vld [vmem:[#allocation7 + $0x74] ss:$8 sps:$4 sm:$0xff]   ;;  %v698_v17 = vld [vmem:[#allocation7 + $0x70] ss:$8 sps:$4 sm:$0xff]   ;;  %v699_v19 = vld [vmem:[#allocation7 + $0x64] ss:$8 sps:$4 sm:$0xff]  }
  0x2c   :  { %272 = vmatprep.subr.bf16.mxu0 %v654_v4  ;;  %517 = vmatprep.subr.bf16.mxu1 %v696_v16  ;;  %v701_v21 = vld [vmem:[#allocation7 + $0x60] ss:$8 sps:$4 sm:$0xff]   ;;  %v702_v22 = vld [vmem:[#allocation7 + $0x54] ss:$8 sps:$4 sm:$0xff]   ;;  %v674_v24 = vld [vmem:[#allocation5 + $0xf0] ss:$8 sps:$4 sm:$0xff]   ;;  %v98_v4 = vlaneseq }
  0x2d   :  { %300 = vmatprep.mubr.bf16.mxu0 %v63_v15  ;;  %518 = vmatpush1.bf16.msra.mxu1 %v698_v17  ;;  %v672_v23 = vld [vmem:[#allocation5 + $0xf4] ss:$8 sps:$4 sm:$0xff]   ;;  %v704_v25 = vld [vmem:[#allocation7 + $0x50] ss:$8 sps:$4 sm:$0xff]   ;;  %v705_v26 = vld [vmem:[#allocation7 + $0x44] ss:$8 sps:$4 sm:$0xff]  }
  0x2e   :  { %519 = vmatprep.subr.bf16.mxu1 %v699_v19  ;;  %v675_v27 = vld [vmem:[#allocation5 + $0xe4] ss:$8 sps:$4 sm:$0xff]   ;;  %v677_v28 = vld [vmem:[#allocation5 + $0xe0] ss:$8 sps:$4 sm:$0xff]   ;;  %v708_v30 = vld [vmem:[#allocation7 + $0x34] ss:$8 sps:$4 sm:$0xff]  }
  0x2f   :  { %273 = vmatpush1.bf16.msra.mxu0 %v656_v5  ;;  %v707_v29 = vld [vmem:[#allocation7 + $0x40] ss:$8 sps:$4 sm:$0xff]   ;;  %v678_v31 = vld [vmem:[#allocation5 + $0xd4] ss:$8 sps:$4 sm:$0xff]   ;;  %v680_v32 = vld [vmem:[#allocation5 + $0xd0] ss:$8 sps:$4 sm:$0xff]  }
  0x30   :  { %274 = vmatprep.subr.bf16.mxu0 %v657_v6  ;;  %v710_v33 = vld [vmem:[#allocation7 + $0x30] ss:$8 sps:$4 sm:$0xff]   ;;  %v711_v34 = vld [vmem:[#allocation7 + $0x24] ss:$8 sps:$4 sm:$0xff]   ;;  %v713_v36 = vld [vmem:[#allocation7 + $0x20] ss:$8 sps:$4 sm:$0xff]  }
  0x31   :  { %520 = vmatpush1.bf16.msra.mxu1 %v701_v21  ;;  %v681_v35 = vld [vmem:[#allocation5 + $0xc4] ss:$8 sps:$4 sm:$0xff]   ;;  %v683_v37 = vld [vmem:[#allocation5 + $0xc0] ss:$8 sps:$4 sm:$0xff]   ;;  %v714_v38 = vld [vmem:[#allocation7 + $0x14] ss:$8 sps:$4 sm:$0xff]  }
  0x32   :  { %521 = vmatprep.subr.bf16.mxu1 %v702_v22  ;;  %v684_v39 = vld [vmem:[#allocation5 + $0xb4] ss:$8 sps:$4 sm:$0xff]   ;;  %v716_v40 = vld [vmem:[#allocation7 + $0x10] ss:$8 sps:$4 sm:$0xff]   ;;  %v717_v42 = vld [vmem:[#allocation7 + $0x4] ss:$8 sps:$4 sm:$0xff]  }
  0x33   :  { %275 = vmatpush1.bf16.msra.mxu0 %v659_v7  ;;  %v686_v41 = vld [vmem:[#allocation5 + $0xb0] ss:$8 sps:$4 sm:$0xff]   ;;  %v687_v43 = vld [vmem:[#allocation5 + $0xa4] ss:$8 sps:$4 sm:$0xff]   ;;  %v719_v44 = vld [vmem:[#allocation7] ss:$8 sps:$4 sm:$0xff]  }
  0x34   :  { %276 = vmatprep.subr.bf16.mxu0 %v660_v8  ;;  %v689_v45 = vld [vmem:[#allocation5 + $0xa0] ss:$8 sps:$4 sm:$0xff]   ;;  %v720_v46 = vld [vmem:[#allocation7 + $0xf4] ss:$8 sps:$4 sm:$0xff]   ;;  %v722_v48 = vld [vmem:[#allocation7 + $0xf0] ss:$8 sps:$4 sm:$0xff]  }
  0x35   :  { %522 = vmatpush1.bf16.msra.mxu1 %v704_v25  ;;  %v690_v47 = vld [vmem:[#allocation5 + $0x94] ss:$8 sps:$4 sm:$0xff]   ;;  %v692_v49 = vld [vmem:[#allocation5 + $0x90] ss:$8 sps:$4 sm:$0xff]   ;;  %v723_v50 = vld [vmem:[#allocation7 + $0xe4] ss:$8 sps:$4 sm:$0xff]  }
  0x36   :  { %523 = vmatprep.subr.bf16.mxu1 %v705_v26  ;;  %v693_v51 = vld [vmem:[#allocation5 + $0x84] ss:$8 sps:$4 sm:$0xff]   ;;  %v725_v52 = vld [vmem:[#allocation7 + $0xe0] ss:$8 sps:$4 sm:$0xff]   ;;  %v60_v54 = vld [vmem:[#allocation2] sm:$0xff]  ;;  %v99_v5 = vshrl.u32 %v98_v4, 7 }
  0x37   :  { %277 = vmatpush1.bf16.msra.mxu0 %v662_v9  ;;  %v695_v53 = vld [vmem:[#allocation5 + $0x80] ss:$8 sps:$4 sm:$0xff]   ;;  %v726_v55 = vld [vmem:[#allocation7 + $0xd4] ss:$8 sps:$4 sm:$0xff]   ;;  %v62_v56 = vpack.c.bf16 %v60_v54, %v60_v54  ;;  %v728_v57 = vld [vmem:[#allocation7 + $0xd0] ss:$8 sps:$4 sm:$0xff]  }
  0x38   :  { %278 = vmatprep.subr.bf16.mxu0 %v663_v10  ;;  %v729_v58 = vld [vmem:[#allocation7 + $0xc4] ss:$8 sps:$4 sm:$0xff]   ;;  %v731_v59 = vld [vmem:[#allocation7 + $0xc0] ss:$8 sps:$4 sm:$0xff]   ;;  %v732_v60 = vld [vmem:[#allocation7 + $0xb4] ss:$8 sps:$4 sm:$0xff]  }
  0x39   :  { %524 = vmatpush1.bf16.msra.mxu1 %v707_v29  ;;  %v734_v61 = vld [vmem:[#allocation7 + $0xb0] ss:$8 sps:$4 sm:$0xff]   ;;  %v735_v62 = vld [vmem:[#allocation7 + $0xa4] ss:$8 sps:$4 sm:$0xff]   ;;  %v737_v63 = vld [vmem:[#allocation7 + $0xa0] ss:$8 sps:$4 sm:$0xff]  }
  0x3a   :  { %525 = vmatprep.subr.bf16.mxu1 %v708_v30  ;;  %v738_v0 = vld [vmem:[#allocation7 + $0x94] ss:$8 sps:$4 sm:$0xff]   ;;  %v740_v1 = vld [vmem:[#allocation7 + $0x90] ss:$8 sps:$4 sm:$0xff]   ;;  %v741_v2 = vld [vmem:[#allocation7 + $0x84] ss:$8 sps:$4 sm:$0xff]  }
  0x3b   :  { %279 = vmatpush1.bf16.msra.mxu0 %v665_v11  ;;  %v743_v3 = vld [vmem:[#allocation7 + $0x80] ss:$8 sps:$4 sm:$0xff]   ;;  %v100_v6 = vsub.s32 0, %v99_v5  ;;  %v96_v7 = vld [vmem:[%s886_s2] sm:$0x3]  ;;  %v104_v8 = vsub.s32 1, %v99_v5 }
  0x3c   :  { %280 = vmatprep.subr.bf16.mxu0 %v666_v12  ;;  %v345_v21 = vld [vmem:[%s888_s4] sm:$0x3]  ;;  %s835_s2 = smov [#allocation8]  }
  0x3d   :  { %526 = vmatpush1.bf16.msra.mxu1 %v710_v33  ;;  %v101_v9 = vrot.slane %v96_v7, %v100_v6  ;;  %v105_v10 = vrot.slane %v96_v7, %v104_v8  ;;  %v350_v22 = vrot.slane %v345_v21, %v100_v6  ;;  %s568_s11 = sshll.u32 %s835_s2, 4  ;;  %s569_s11 = int_to_ptr.vmem [resolvable:$true] %s568_s11 }
  0x3e   :  { %527 = vmatprep.subr.bf16.mxu1 %v711_v34  ;;  %s804_s12 = scalar_lea.vmem %s569_s11, 256  ;;  %p809_p2 = scmp.lt.s32.totalorder %s569_s11, %s569_s11 }
  0x3f   :  { %281 = vmatpush1.bf16.msra.mxu0 %v668_v13  ;;  %p805_p1 = scmp.ne.s32.totalorder %s569_s11, %s804_s12  ;;  %p810_p3 = scmp.lt.s32.totalorder %s804_s12, %s804_s12 }
  0x40   :  { %282 = vmatprep.subr.bf16.mxu0 %v669_v18 }
  0x41   :  { %528 = vmatpush1.bf16.msra.mxu1 %v713_v36  ;;  %p811_p4 = por %p810_p3, %p809_p2 }
  0x42   :  { %529 = vmatprep.subr.bf16.mxu1 %v714_v38 }
  0x43   :  { %283 = vmatpush1.bf16.msra.mxu0 %v671_v20  ;;  %p812_p5 = pnand %p811_p4, %p805_p1 }
  0x44   :  { %284 = vmatprep.subr.bf16.mxu0 %v672_v23  ;;  %v354_v23 = vrot.slane %v345_v21, %v104_v8 }
  0x45   :  { %530 = vmatpush1.bf16.msra.mxu1 %v716_v40 }
  0x46   :  { %531 = vmatprep.subr.bf16.mxu1 %v717_v42 }
  0x47   :  { %285 = vmatpush2.bf16.msra.mxu0 %v674_v24 }
  0x48   :  { %286 = vmatprep.subr.bf16.mxu0 %v675_v27 }
  0x49   :  { %532 = vmatpush1.bf16.msra.mxu1 %v719_v44 }
  0x4a   :  { %533 = vmatprep.subr.bf16.mxu1 %v720_v46 }
  0x4b   :  { %287 = vmatpush2.bf16.msra.mxu0 %v677_v28 }
  0x4c   :  { %288 = vmatprep.subr.bf16.mxu0 %v678_v31 }
  0x4d   :  { %534 = vmatpush2.bf16.msra.mxu1 %v722_v48 }
  0x4e   :  { %535 = vmatprep.subr.bf16.mxu1 %v723_v50 }
  0x4f   :  { %289 = vmatpush2.bf16.msra.mxu0 %v680_v32 }
  0x50   :  { %290 = vmatprep.subr.bf16.mxu0 %v681_v35 }
  0x51   :  { %536 = vmatpush2.bf16.msra.mxu1 %v725_v52 }
  0x52   :  { %537 = vmatprep.subr.bf16.mxu1 %v726_v55 }
  0x53   :  { %291 = vmatpush2.bf16.msra.mxu0 %v683_v37 }
  0x54   :  { %292 = vmatprep.subr.bf16.mxu0 %v684_v39 }
  0x55   :  { %538 = vmatpush2.bf16.msra.mxu1 %v728_v57 }
  0x56   :  { %539 = vmatprep.subr.bf16.mxu1 %v729_v58 }
  0x57   :  { %293 = vmatpush2.bf16.msra.mxu0 %v686_v41 }
  0x58   :  { %294 = vmatprep.subr.bf16.mxu0 %v687_v43 }
  0x59   :  { %540 = vmatpush2.bf16.msra.mxu1 %v731_v59 }
  0x5a   :  { %541 = vmatprep.subr.bf16.mxu1 %v732_v60 }
  0x5b   :  { %295 = vmatpush2.bf16.msra.mxu0 %v689_v45 }
  0x5c   :  { %296 = vmatprep.subr.bf16.mxu0 %v690_v47 }
  0x5d   :  { %542 = vmatpush2.bf16.msra.mxu1 %v734_v61 }
  0x5e   :  { %543 = vmatprep.subr.bf16.mxu1 %v735_v62 }
  0x5f   :  { %297 = vmatpush2.bf16.msra.mxu0 %v692_v49 }
  0x60   :  { %298 = vmatprep.subr.bf16.mxu0 %v693_v51 }
  0x61   :  { %544 = vmatpush2.bf16.msra.mxu1 %v737_v63 }
  0x62   :  { %545 = vmatprep.subr.bf16.mxu1 %v738_v0 }
  0x63   :  { %299 = vmatpush2.bf16.msra.mxu0 %v695_v53 }
  0x65   :  { %546 = vmatpush2.bf16.msra.mxu1 %v740_v1 }
  0x66   :  { %301 = vmatmul.mubr.bf16.vlgmr.msra.gmra.mxu0 %v62_v56  ;;  %547 = vmatprep.subr.bf16.mxu1 %v741_v2 }
  0x69   :  { %548 = vmatpush2.bf16.msra.mxu1 %v743_v3 }
 0x126   :  { %v302_v11 = vpop.f32.mrf.mxu0 }
 0x127   :  { %v303_v12 = vadd.f32 %v302_v11, %v101_v9 }
 0x128   :  { %v304_v13 = vpop.f32.mrf.mxu0 }
 0x129   :  { %v305_v14 = vadd.f32 %v304_v13, %v105_v10  ;;  %v309_v15 = vmax.f32 %v303_v12, 0.0 }
 0x12a   :  { %v306_v16 = vpop.f32.mrf.mxu0 }
 0x12b   :  { %v310_v17 = vmax.f32 %v305_v14, 0.0  ;;  %v311_v20 = vpack.c.bf16 %v309_v15, %v309_v15 }
 0x12c   :  { %v307_v18 = vpop.f32.mrf.mxu0 }
 0x12d   :  { %v312_v19 = vpack.c.bf16 %v310_v17, %v310_v17 }
 0x12f   :  { %549 = vmatprep.mubr.bf16.mxu1 %v312_v19 }
 0x130   :  { %550 = vmatmul.mubr.bf16.vlgmr.msra.gmra.mxu1 %v311_v20 }
 0x1f0   :  { %v551_v24 = vpop.f32.mrf.mxu1 }
 0x1f1   :  { %v552_v25 = vadd.f32 %v551_v24, %v350_v22 }
 0x1f2   :  { %v553_v26 = vpop.f32.mrf.mxu1 }
 0x1f3   :  { %v558_v27 = vmax.f32 %v552_v25, 0.0  ;;  %v554_v28 = vadd.f32 %v553_v26, %v354_v23 }
 0x1f4   :  { %v555_v29 = vpop.f32.mrf.mxu1 }
 0x1f5   :  { %560 = vst [vmem:[#allocation8] sm:$0xff] %v558_v27  ;;  %v559_v30 = vmax.f32 %v554_v28, 0.0 }
 0x1f6   :  { %v556_v31 = vpop.f32.mrf.mxu1 }
 0x1f7   :  { %561 = vst [vmem:[#allocation8 + $0x8] sm:$0xff] %v559_v30 }
 0x1f8   :  { %815 = shalt.err (!%p812_p5)
}
 0x1f9   :  { %571 = dma.vmem_to_hbm [thread:$0]  %s569_s11, 256, %s889_s5, [#allocation4]  }
 0x1fa   :  { %828 = dma.done.wait [#allocation4], 256  }
 0x1fb   :  { %829 = vsyncadd [#allocation4], 4294967040 }
 0x1fc   :  { %575 = vsyncpa [#allocation3], 1 }
 0x1fd   :  { %576 = vsyncpa [#allocation6], 1 }
 0x1fe   :  { %577 = vsyncpa [#allocation4], 1 }

</bundles_post_ra>
